<compile_context>
chip_gen: v7x
topology: tpu7x:2x2x1
jax: 0.10.0
libtpu: 0.0.40
codegen_flags: <defaults>
</compile_context>

<pallas_src>
import functools

import jax
import jax.numpy as jnp
from jax.experimental import pallas as pl
from jax.experimental.pallas import tpu as pltpu


def _ce2d_kernel(out_ref, lab_ref, part_ref, acc_ref, *, s_total, ts, needs_mask):
    # out_ref / lab_ref: (1, C, TS) tiles of logits / soft labels (C on sublanes,
    #                    spatial on lanes)
    # part_ref:          (1, 1, 128) per-batch partial-sum output block
    # acc_ref:           (1, C, TS) f32 scratch, element-wise accumulator across
    #                    the spatial grid axis
    s_idx = pl.program_id(1)

    @pl.when(s_idx == 0)
    def _():
        acc_ref[...] = jnp.zeros_like(acc_ref)

    x = out_ref[...].astype(jnp.float32)      # (1, C, TS)
    lab = lab_ref[...].astype(jnp.float32)    # (1, C, TS)

    if needs_mask:
        # Tail tile: zero out columns past the true spatial extent. Zero labels
        # make those columns contribute exactly 0 to the loss.
        col = jax.lax.broadcasted_iota(jnp.int32, x.shape, dimension=2)
        valid = (col + s_idx * ts) < s_total
        x = jnp.where(valid, x, 0.0)
        lab = jnp.where(valid, lab, 0.0)

    # Numerically stable log_softmax over the channel axis (axis 1 = sublanes).
    m = jnp.max(x, axis=1, keepdims=True)
    lse = jnp.log(jnp.sum(jnp.exp(x - m), axis=1, keepdims=True)) + m
    logsm = x - lse

    # norm: log(label) where label != 0, else 0 (matches the masked in-place log).
    nonzero = lab != 0
    norm = jnp.where(nonzero, jnp.log(jnp.where(nonzero, lab, 1.0)), 0.0)

    # Element-wise accumulate; the cross-lane/sublane reduce happens once below.
    acc_ref[...] += (logsm - norm) * lab

    @pl.when(s_idx == pl.num_programs(1) - 1)
    def _():
        total = -jnp.sum(acc_ref[...])
        part_ref[...] = jnp.broadcast_to(total, part_ref.shape).astype(jnp.float32)


def cross_entropy_loss_2d(outputs, labels, *, target_tile_bytes=4 * 1024 * 1024):
    """outputs, labels: NCHW arrays (same shape, f32 or bf16). Returns scalar loss."""
    n, c, h, w = outputs.shape
    assert labels.shape == outputs.shape
    s_total = h * w

    # Free reshape (no transpose): (N, C, H, W) -> (N, C, H*W).
    x3 = outputs.reshape(n, c, s_total)
    l3 = labels.reshape(n, c, s_total)

    # Spatial tile: multiple of 128 lanes, sized so each input tile carries
    # ~target_tile_bytes of real data (clipped to the padded spatial extent).
    itemsize = jnp.dtype(outputs.dtype).itemsize
    ts = max(128, (target_tile_bytes // (c * itemsize)) // 128 * 128)
    s_pad = pl.cdiv(s_total, 128) * 128
    ts = min(ts, s_pad)
    num_s = pl.cdiv(s_total, ts)
    needs_mask = (s_total % ts) != 0

    kernel = functools.partial(
        _ce2d_kernel, s_total=s_total, ts=ts, needs_mask=needs_mask
    )

    partials = pl.pallas_call(
        kernel,
        out_shape=jax.ShapeDtypeStruct((n, 1, 128), jnp.float32),
        grid_spec=pltpu.PrefetchScalarGridSpec(
            num_scalar_prefetch=0,
            grid=(n, num_s),
            in_specs=[
                pl.BlockSpec((1, c, ts), lambda b, s: (b, 0, s)),
                pl.BlockSpec((1, c, ts), lambda b, s: (b, 0, s)),
            ],
            out_specs=pl.BlockSpec((1, 1, 128), lambda b, s: (b, 0, 0)),
            scratch_shapes=[pltpu.VMEM((1, c, ts), jnp.float32)],
        ),
        compiler_params=pltpu.CompilerParams(
            # Batch axis is independent (per-batch output blocks) -> "parallel"
            # so v7x can split it across its two TensorCores; the spatial axis
            # carries the running accumulator -> "arbitrary".
            dimension_semantics=("parallel", "arbitrary"),
            # Raised from the v5e default so the enlarged double-buffered tiles
            # (2 inputs x 2 buffers x ~4 MiB) + the f32 accumulator fit, while
            # staying well under v7x's 64 MiB physical VMEM.
            vmem_limit_bytes=32 * 1024 * 1024,
        ),
    )(x3, l3)

    # Each output block holds the same scalar replicated across 128 lanes.
    return jnp.sum(partials[:, 0, 0]) / jnp.float32(n)


def _reference(outputs, labels):
    # Pure-JAX reference mirroring the PyTorch forward.
    logsm = jax.nn.log_softmax(outputs.astype(jnp.float32), axis=1)
    lab = labels.astype(jnp.float32)
    nonzero = lab != 0
    norm = jnp.where(nonzero, jnp.log(jnp.where(nonzero, lab, 1.0)), 0.0)
    return -jnp.sum((logsm - norm) * lab) / outputs.shape[0]


if __name__ == "__main__":
    key = jax.random.PRNGKey(0)
    k1, k2 = jax.random.split(key)

    N, C, H, W = 2, 4, 16, 16
    outputs = jax.random.normal(k1, (N, C, H, W), dtype=jnp.float32)
    # Soft labels: per-pixel probability distribution over C classes, with
    # some exact zeros to exercise the masked-log branch.
    raw = jax.random.uniform(k2, (N, C, H, W), dtype=jnp.float32)
    raw = jnp.where(raw < 0.3, 0.0, raw)
    labels = raw / jnp.maximum(jnp.sum(raw, axis=1, keepdims=True), 1e-6)

    loss = cross_entropy_loss_2d(outputs, labels)
    loss = jax.block_until_ready(loss)

    ref = jax.block_until_ready(_reference(outputs, labels))
    assert jnp.allclose(loss, ref, rtol=1e-5, atol=1e-5), (loss, ref)

    print("KERNEL_OK")
</pallas_src>

<mosaic_0001>
module attributes {stable_mosaic.version = 11 : i64} {
  func.func @_ce2d_kernel(%arg0: i32, %arg1: i32, %arg2: memref<1x4x256xf32, #tpu.memory_space<vmem>>, %arg3: memref<1x4x256xf32, #tpu.memory_space<vmem>>, %arg4: memref<1x1x128xf32, #tpu.memory_space<vmem>>, %arg5: memref<1x4x256xf32, #tpu.memory_space<vmem>>) attributes {dimension_semantics = [#tpu.dimension_semantics<parallel>, #tpu.dimension_semantics<arbitrary>], iteration_bounds = array<i64: 2, 1>, scalar_prefetch = 0 : i64, scratch_operands = 1 : i64, tpu.core_type = #tpu.core_type<tc>, window_params = [{transform_indices = @transform_0, window_bounds = array<i64: 1, 4, 256>}, {transform_indices = @transform_1, window_bounds = array<i64: 1, 4, 256>}, {transform_indices = @transform_2, window_bounds = array<i64: 1, 1, 128>}]} {
    %c0_i32 = arith.constant 0 : i32
    %0 = arith.cmpi eq, %arg1, %c0_i32 : i32
    %1 = arith.extui %0 : i1 to i32
    %c0_i32_0 = arith.constant 0 : i32
    %2 = arith.cmpi ne, %1, %c0_i32_0 : i32
    scf.if %2 {
      %cst_18 = arith.constant 0.000000e+00 : f32
      %31 = vector.broadcast %cst_18 : f32 to vector<1x4x256xf32>
      %c0_19 = arith.constant 0 : index
      %c0_20 = arith.constant 0 : index
      %c0_21 = arith.constant 0 : index
      %32 = vector.load %arg5[%c0_19, %c0_20, %c0_21] : memref<1x4x256xf32, #tpu.memory_space<vmem>>, vector<1x4x256xf32>
      tpu.vector_store %arg5[%c0_19, %c0_20, %c0_21], %31 {strides = array<i32>} : memref<1x4x256xf32, #tpu.memory_space<vmem>>, vector<1x4x256xf32>,
    } else {
    }
    %c0 = arith.constant 0 : index
    %c0_1 = arith.constant 0 : index
    %c0_2 = arith.constant 0 : index
    %3 = vector.load %arg2[%c0, %c0_1, %c0_2] : memref<1x4x256xf32, #tpu.memory_space<vmem>>, vector<1x4x256xf32>
    %c0_3 = arith.constant 0 : index
    %c0_4 = arith.constant 0 : index
    %c0_5 = arith.constant 0 : index
    %4 = vector.load %arg3[%c0_3, %c0_4, %c0_5] : memref<1x4x256xf32, #tpu.memory_space<vmem>>, vector<1x4x256xf32>
    %cst = arith.constant dense<0xFF800000> : vector<1x256xf32>
    %5 = vector.multi_reduction <maximumf>, %3, %cst [1] : vector<1x4x256xf32> to vector<1x256xf32>
    %6 = vector.shape_cast %5 : vector<1x256xf32> to vector<1x1x256xf32>
    %7 = vector.broadcast %6 : vector<1x1x256xf32> to vector<1x4x256xf32>
    %8 = arith.subf %3, %7 : vector<1x4x256xf32>
    %9 = math.exp %8 : vector<1x4x256xf32>
    %cst_6 = arith.constant dense<0.000000e+00> : vector<1x256xf32>
    %10 = vector.multi_reduction <add>, %9, %cst_6 [1] : vector<1x4x256xf32> to vector<1x256xf32>
    %11 = vector.shape_cast %10 : vector<1x256xf32> to vector<1x1x256xf32>
    %12 = math.log %11 : vector<1x1x256xf32>
    %13 = arith.addf %12, %6 : vector<1x1x256xf32>
    %14 = vector.broadcast %13 : vector<1x1x256xf32> to vector<1x4x256xf32>
    %15 = arith.subf %3, %14 : vector<1x4x256xf32>
    %cst_7 = arith.constant 0.000000e+00 : f32
    %16 = vector.broadcast %cst_7 : f32 to vector<1x4x256xf32>
    %17 = arith.cmpf one, %4, %16 : vector<1x4x256xf32>
    %cst_8 = arith.constant 1.000000e+00 : f32
    %18 = vector.broadcast %cst_8 : f32 to vector<1x4x256xf32>
    %19 = arith.select %17, %4, %18 : vector<1x4x256xi1>, vector<1x4x256xf32>
    %20 = math.log %19 : vector<1x4x256xf32>
    %cst_9 = arith.constant 0.000000e+00 : f32
    %21 = vector.broadcast %cst_9 : f32 to vector<1x4x256xf32>
    %22 = arith.select %17, %20, %21 : vector<1x4x256xi1>, vector<1x4x256xf32>
    %c0_10 = arith.constant 0 : index
    %c0_11 = arith.constant 0 : index
    %c0_12 = arith.constant 0 : index
    %23 = vector.load %arg5[%c0_10, %c0_11, %c0_12] : memref<1x4x256xf32, #tpu.memory_space<vmem>>, vector<1x4x256xf32>
    %24 = arith.subf %15, %22 : vector<1x4x256xf32>
    %25 = arith.mulf %24, %4 : vector<1x4x256xf32>
    %26 = arith.addf %23, %25 : vector<1x4x256xf32>
    %c0_13 = arith.constant 0 : index
    %c0_14 = arith.constant 0 : index
    %c0_15 = arith.constant 0 : index
    %27 = vector.load %arg5[%c0_13, %c0_14, %c0_15] : memref<1x4x256xf32, #tpu.memory_space<vmem>>, vector<1x4x256xf32>
    tpu.vector_store %arg5[%c0_13, %c0_14, %c0_15], %26 {strides = array<i32>} : memref<1x4x256xf32, #tpu.memory_space<vmem>>, vector<1x4x256xf32>,
    %c0_i32_16 = arith.constant 0 : i32
    %28 = arith.cmpi eq, %arg1, %c0_i32_16 : i32
    %29 = arith.extui %28 : i1 to i32
    %c0_i32_17 = arith.constant 0 : i32
    %30 = arith.cmpi ne, %29, %c0_i32_17 : i32
    scf.if %30 {
      %c0_18 = arith.constant 0 : index
      %c0_19 = arith.constant 0 : index
      %c0_20 = arith.constant 0 : index
      %31 = vector.load %arg5[%c0_18, %c0_19, %c0_20] : memref<1x4x256xf32, #tpu.memory_space<vmem>>, vector<1x4x256xf32>
      %32 = vector.shape_cast %31 : vector<1x4x256xf32> to vector<1x1x4x256xf32>
      %cst_21 = arith.constant dense<0.000000e+00> : vector<1xf32>
      %33 = vector.multi_reduction <add>, %32, %cst_21 [1, 2, 3] : vector<1x1x4x256xf32> to vector<1xf32>
      %34 = vector.shape_cast %33 : vector<1xf32> to vector<1x1x1x1xf32>
      %35 = vector.extract %34[0, 0, 0, 0] : f32 from vector<1x1x1x1xf32>
      %cst_22 = arith.constant 0.000000e+00 : f32
      %36 = arith.subf %cst_22, %35 : f32
      %37 = vector.broadcast %36 : f32 to vector<1x1x128xf32>
      %c0_23 = arith.constant 0 : index
      %c0_24 = arith.constant 0 : index
      %c0_25 = arith.constant 0 : index
      %38 = vector.load %arg4[%c0_23, %c0_24, %c0_25] : memref<1x1x128xf32, #tpu.memory_space<vmem>>, vector<1x1x128xf32>
      tpu.vector_store %arg4[%c0_23, %c0_24, %c0_25], %37 {strides = array<i32>} : memref<1x1x128xf32, #tpu.memory_space<vmem>>, vector<1x1x128xf32>,
    } else {
    }
    return
  }
  func.func @transform_0(%arg0: i32, %arg1: i32) -> (i32, i32, i32) {
    %c0_i32 = arith.constant 0 : i32
    %c0_i32_0 = arith.constant 0 : i32
    return %arg0, %c0_i32, %arg1 : i32, i32, i32
  }
  func.func @transform_1(%arg0: i32, %arg1: i32) -> (i32, i32, i32) {
    %c0_i32 = arith.constant 0 : i32
    %c0_i32_0 = arith.constant 0 : i32
    return %arg0, %c0_i32, %arg1 : i32, i32, i32
  }
  func.func @transform_2(%arg0: i32, %arg1: i32) -> (i32, i32, i32) {
    %c0_i32 = arith.constant 0 : i32
    %c0_i32_0 = arith.constant 0 : i32
    %c0_i32_1 = arith.constant 0 : i32
    return %arg0, %c0_i32, %c0_i32_0 : i32, i32, i32
  }
}

</mosaic_0001>

<bundles_post_ra>
// kernel: tpu_custom_call.1
= control target key start
LH: loop header
LB: loop body
LE: loop exit
PB: predicated region body
PF: predicated region fallthrough
CT: control target
= control target key end

     0   :  { %7 = vsyncpa [#allocation4], 0  ;;  %s921_s0 = inlined_call_operand.hbm [shape: f32[2,4,256], index: 0, kind: input, shape index: {}]   ;;  %s922_s1 = inlined_call_operand.hbm [shape: f32[2,4,256], index: 1, kind: input, shape index: {}]   ;;  %s923_s2 = inlined_call_operand.hbm [shape: f32[2,1,128], index: 2, kind: output, shape index: {}]  }
   0x1   :  { %9 = vsyncpa [#allocation4 + $0x1], 0 }
   0x2   :  { %10 = vsyncpa [#allocation7], 0 }
   0x3   :  { %12 = vsyncpa [#allocation7 + $0x1], 0 }
   0x4   :  { %13 = vsyncpa [#allocation5], 0 }
   0x5   :  { %15 = vsyncpa [#allocation5 + $0x1], 0  ;;  %s689_s9 = smov 0   ;;  %s691_s10 = smov 0  }
   0x6   :  { %s693_s11 = smov 0   ;;  %s695_s12 = smov 0  }
   0x7   :  { %s697_s13 = smov 0   ;;  %s699_s14 = smov 0  }
   0x8 LB: > { %s427_s15 = sadd.s32 4294967295, %s669_s14   ;;  %s428_s16 = sadd.s32 4294967294, %s669_s14   ;;  %s669_s14 = sphi %s699_s14, %s21_s14   ;;  %s665_s13 = sphi %s697_s13, %s943_s13   ;;  %s661_s12 = sphi %s695_s12, %s942_s12   ;;  %s657_s11 = sphi %s693_s11, %s941_s11   ;;  %s653_s10 = sphi %s691_s10, %s940_s10   ;;  %s649_s9 = sphi %s689_s9, %s939_s9  }
   0x9   : > { %s33_s17 = sadd.s32 1, %s665_s13  ;;  %s42_s18 = sadd.s32 1, %s657_s11 }
   0xa   : > { %p35_p0 = scmp.ge.s32.totalorder %s33_s17, 2  ;;  %p49_p1 = scmp.ne.s32.totalorder %s657_s11, %s653_s10 }
   0xb   : > { %p50_p2 = scmp.eq.s32.totalorder %s669_s14, 0  ;;  %p55_p3 = scmp.ne.s32.totalorder %s653_s10, %s649_s9 }
   0xc   : > { %s945_s17 = smov (%p35_p0, %s33_s17), 0  ;;  %p56_p5 = scmp.eq.s32.totalorder %s427_s15, 0 }
   0xd   : > { %p730_p4 = por %p50_p2, %p49_p1  ;;  %s37_s20 = ssub.s32 %s665_s13, %s945_s17 }
   0xe   : > { %p107_p6 = scmp.eq.s32.totalorder %s427_s15, 1  ;;  %p40_p7 = scmp.eq.s32.totalorder %s37_s20, 0 }
   0xf   : > { %p736_p8 = por %p56_p5, %p55_p3  ;;  %p113_p10 = scmp.eq.s32.totalorder %s428_s16, 1 }
  0x10   : > { %p740_p9 = por %p107_p6, %p49_p1  ;;  %p464_p13 = scmp.lt.s32.totalorder %s669_s14, 2 }
  0x11   : > { %s927_s21 = scalar_select %p736_p8, 1, 0 }
  0x12   : > { %s928_s22 = scalar_select %p740_p9, 1, 0 }
  0x13   : > { %s745_s23 = scalar_select %p40_p7, %s657_s11, %s42_s18  }
  0x14   : > { %p747_p11 = por %p113_p10, %p55_p3  ;;  %s754_s25 = sand.u32 1, %s657_s11  }
  0x15   : > { %s431_s26 = sshll.u32 %s754_s25, 3  ;;  %s443_s27 = sshll.u32 %s665_s13, 7 }
  0x16   : > { %s929_s24 = scalar_select %p747_p11, 1, 0 }
  0x17   : > { %s763_s30 = scalar_lea.hbm %s921_s0, %s443_s27  ;;  %s137_s3 = scalar_lea.vmem [#allocation3], %s431_s26 }
  0x18   : > { %s147_s4 = sshll.u32 %s137_s3, 4  ;;  %p771_p0 = pnand %p464_p13, %p730_p4  ;;  %s767_s4 = int_to_ptr.vmem [resolvable:$true] %s147_s4 }
  0x19   : > { %s134_s6 = scalar_lea.sflag [#allocation4], %s754_s25  ;;  %s523_s7 = scalar_lea.hbm %s763_s30, 128 }
  0x1a   : > { %p524_p3 = scmp.ne.s32.totalorder %s763_s30, %s523_s7  ;;  %p525_p5 = pneg %p771_p0 }
  0x1b   : > { %s528_s16 = scalar_lea.hbm %s921_s0, 256  ;;  %p529_p4 = scmp.lt.u32.totalorder %s763_s30, %s921_s0 }
  0x1c   : > { %p526_p6 = pnand %p525_p5, %p524_p3  ;;  %p530_p10 = scmp.lt.u32.totalorder %s528_s16, %s523_s7 }
  0x1d   : > { %p532_p12 = scmp.lt.u32.totalorder %s523_s7, %s763_s30 }
  0x1e   : > { %p527_p7 = pneg %p526_p6  ;;  %p531_p13 = por %p530_p10, %p529_p4 }
  0x20   : > { %p533_p1 = por %p532_p12, %p531_p13 }
  0x22   : > { %p534_p2 = pnand %p533_p1, %p527_p7 }
  0x24   : > { %537 = shalt.err (!%p534_p2)
}
  0x25   : > { %s538_s20 = scalar_lea.vmem %s767_s4, 128  ;;  %s671_s28 = smov [#allocation3]  }
  0x26   : > { %p539_p3 = scmp.ne.s32.totalorder %s767_s4, %s538_s20  ;;  %s543_s29 = sshll.u32 %s671_s28, 4  ;;  %s544_s29 = int_to_ptr.vmem [resolvable:$false] %s543_s29 }
  0x27   : > { %s545_s3 = scalar_lea.vmem %s544_s29, 256  ;;  %p546_p9 = scmp.lt.s32.totalorder %s767_s4, %s544_s29 }
  0x28   : > { %p541_p6 = pnand %p539_p3, %p525_p5  ;;  %p547_p4 = scmp.lt.s32.totalorder %s545_s3, %s538_s20 }
  0x2a   : > { %p542_p11 = pneg %p541_p6  ;;  %p548_p10 = por %p547_p4, %p546_p9 }
  0x2c   : > { %p549_p12 = pnand %p548_p10, %p542_p11 }
  0x2e   : > { %552 = shalt.err (!%p549_p12)
}
  0x2f   : > { %456 = dma.hbm_to_vmem [thread:$0]  (!%p771_p0), %s763_s30, 128, %s767_s4, %s134_s6  }
  0x30   : > { %p931_p1 = scmp.lt.s32.totalorder %s669_s14, 3  ;;  %p932_p2 = scmp.ge.s32.totalorder %s669_s14, 1 }
  0x31   : > { %s816_s16 = scalar_lea.hbm %s922_s1, %s443_s27  ;;  %s158_s18 = scalar_lea.vmem [#allocation6], %s431_s26 }
  0x32   : > { %p807_p7 = pnand %p932_p2, %p931_p1  ;;  %s168_s19 = sshll.u32 %s158_s18, 4  ;;  %s169_s19 = int_to_ptr.vmem [resolvable:$true] %s168_s19 }
  0x33   : > { %s155_s30 = scalar_lea.sflag [#allocation7], %s754_s25  ;;  %s553_s4 = scalar_lea.hbm %s816_s16, 128 }
  0x34   : > { %s933_s7 = scalar_select %p807_p7, 1, 0 }
  0x35   : > { %p554_p9 = scmp.ne.s32.totalorder %s816_s16, %s553_s4  ;;  %s558_s27 = scalar_lea.hbm %s922_s1, 256 }
  0x36   : > { %p559_p3 = scmp.lt.u32.totalorder %s816_s16, %s922_s1  ;;  %p560_p6 = scmp.lt.u32.totalorder %s558_s27, %s553_s4 }
  0x37   : > { %p556_p11 = pnand %p554_p9, %p525_p5  ;;  %p562_p10 = scmp.lt.u32.totalorder %s553_s4, %s816_s16 }
  0x38   : > { %p561_p4 = por %p560_p6, %p559_p3 }
  0x39   : > { %p557_p13 = pneg %p556_p11 }
  0x3a   : > { %p563_p12 = por %p562_p10, %p561_p4 }
  0x3c   : > { %p564_p1 = pnand %p563_p12, %p557_p13 }
  0x3e   : > { %567 = shalt.err (!%p564_p1)
}
  0x3f   : > { %s568_s25 = scalar_lea.vmem %s169_s19, 128  ;;  %s672_s26 = smov [#allocation6]  }
  0x40   : > { %p569_p2 = scmp.ne.s32.totalorder %s169_s19, %s568_s25  ;;  %s573_s3 = sshll.u32 %s672_s26, 4  ;;  %s574_s3 = int_to_ptr.vmem [resolvable:$false] %s573_s3 }
  0x41   : > { %s575_s8 = scalar_lea.vmem %s574_s3, 256  ;;  %p576_p8 = scmp.lt.s32.totalorder %s169_s19, %s574_s3 }
  0x42   : > { %p571_p9 = pnand %p569_p2, %p525_p5  ;;  %p577_p7 = scmp.lt.s32.totalorder %s575_s8, %s568_s25 }
  0x44   : > { %p572_p11 = pneg %p571_p9  ;;  %p578_p3 = por %p577_p7, %p576_p8 }
  0x46   : > { %p579_p6 = pnand %p578_p3, %p572_p11 }
  0x48   : > { %582 = shalt.err (!%p579_p6)
}
  0x49   : > { %459 = dma.hbm_to_vmem [thread:$0]  (!%p771_p0), %s816_s16, 128, %s169_s19, %s155_s30  }
  0x4a   : > { %p934_p13 = scmp.ne.s32.totalorder %s933_s7, 0 }
  0x4b   : > { %s843_s15 = sand.u32 (!%p934_p13), 1, %s653_s10   ;;  %p935_p5 = scmp.ne.s32.totalorder (!%p934_p13), %s927_s21, 0 }
  0x4c   : > { %177 = sbr.rel (%p934_p13) target bundleno = 383 (0x17f), region = 28  ;;  %s438_s18 = sshll.u32 (!%p934_p13), %s843_s15, 3 }
  0x4d   : > { %s180_s4 = scalar_lea.sflag (!%p934_p13), [#allocation4], %s843_s15  ;;  %s183_s6 = scalar_lea.vmem (!%p934_p13), [#allocation3], %s438_s18 }
  0x53   : > { %636 = dma.done.wait (%p935_p5), %s180_s4, 128  }
  0x54   : > { %638 = vsyncadd (%p935_p5), %s180_s4, 4294967168  ;;  %s189_s5 = scalar_lea.sflag [#allocation7], %s843_s15  ;;  %s852_s16 = scalar_lea.vmem [#allocation6], %s438_s18 }
  0x55   : > { %640 = dma.done.wait (%p935_p5), %s189_s5, 128  }
  0x56   : > { %642 = vsyncadd (%p935_p5), %s189_s5, 4294967168  ;;  %vm229_vm0 = vcmask 1043456   ;;  %v224_v0 = vld [vmem:[%s183_s6] sm:$0xff]  ;;  %v225_v26 = vld [vmem:[%s852_s16] sm:$0xff]  ;;  %s216_s21 = scalar_lea.vmem [#allocation8], %s843_s15  ;;  %s440_s19 = sshll.u32 %s661_s12, 4 }
  0x57   : > { %v227_v1 = vcombine.high %v224_v0, %v224_v0  ;;  %v230_v2 = vsel %vm229_vm0, %v224_v0, -inf  ;;  %vm279_vm1 = vcmp.ne.f32.partialorder %v225_v26, 0.0  ;;  %s324_s7 = sshll.u32 %s216_s21, 4  ;;  %s872_s29 = scalar_lea.hbm %s923_s2, %s440_s19  ;;  %s874_s7 = int_to_ptr.vmem [resolvable:$true] %s324_s7 }
  0x58   : > { %v231_v3 = vrot.slane %v230_v2, 4  ;;  %v280_v35 = vsel %vm279_vm1, %v225_v26, 1.0  ;;  %s312_s25 = scalar_lea.sflag [#allocation5], %s843_s15  ;;  %s583_s26 = scalar_lea.vmem %s874_s7, 16 }
  0x59   : > { %v237_v4 = vsel %vm229_vm0, %v227_v1, -inf  ;;  %p584_p8 = scmp.ne.s32.totalorder %s874_s7, %s583_s26  ;;  %p936_p0 = scmp.ne.s32.totalorder %s928_s22, 0 }
  0x5a   : > { %v232_v5 = vmax.f32 %v230_v2, %v231_v3  ;;  %v238_v6 = vrot.slane %v237_v4, 4  ;;  %s673_s12 = smov [#allocation8]  }
  0x5b   : > { %p585_p7 = pnand %p584_p8, %p936_p0  ;;  %s587_s3 = sshll.u32 %s673_s12, 4  ;;  %s588_s3 = int_to_ptr.vmem [resolvable:$false] %s587_s3 }
  0x5c   : > { %v233_v7 = vrot.slane %v232_v5, 2  ;;  %v239_v8 = vmax.f32 %v237_v4, %v238_v6  ;;  %s589_s8 = scalar_lea.vmem %s588_s3, 32  ;;  %p590_p10 = scmp.lt.s32.totalorder %s874_s7, %s588_s3 }
  0x5d   : > { %p586_p4 = pneg %p585_p7  ;;  %p591_p12 = scmp.lt.s32.totalorder %s589_s8, %s583_s26 }
  0x5e   : > { %v234_v9 = vmax.f32 %v232_v5, %v233_v7  ;;  %v240_v10 = vrot.slane %v239_v8, 2 }
  0x5f   : > { %p592_p1 = por %p591_p12, %p590_p10 }
  0x60   : > { %v235_v11 = vrot.slane %v234_v9, 1  ;;  %v241_v12 = vmax.f32 %v239_v8, %v240_v10 }
  0x61   : > { %p593_p2 = pnand %p592_p1, %p586_p4 }
  0x62   : > { %v236_v13 = vmax.f32 %v234_v9, %v235_v11  ;;  %v242_v14 = vrot.slane %v241_v12, 1 }
  0x64   : > { %v243_v15 = vmax.f32 %v241_v12, %v242_v14 }
  0x66   : > { %v246_v16 = vcombine.low %v236_v13, %v243_v15 }
  0x68   : > { %v248_v17 = vsub.f32 %v224_v0, %v246_v16 }
  0x6a   : > { %v249_v18 = vmul.f32 1.442695, %v248_v17 }
  0x6c   : > { %515 = vpow2.f32 %v249_v18 }
  0x76   : > { %v516_v19 = vpop.eup %515 }
  0x77   : > { %v252_v20 = vcombine.high %v516_v19, %v516_v19  ;;  %v254_v21 = vsel %vm229_vm0, %v516_v19, 0.0 }
  0x78   : > { %v255_v22 = vrot.slane %v254_v21, 4 }
  0x79   : > { %v261_v23 = vsel %vm229_vm0, %v252_v20, 0.0 }
  0x7a   : > { %v256_v24 = vadd.f32 %v255_v22, %v254_v21  ;;  %v262_v25 = vrot.slane %v261_v23, 4 }
  0x7c   : > { %v257_v27 = vrot.slane %v256_v24, 2  ;;  %v263_v28 = vadd.f32 %v262_v25, %v261_v23 }
  0x7e   : > { %v258_v29 = vadd.f32 %v257_v27, %v256_v24  ;;  %v264_v30 = vrot.slane %v263_v28, 2 }
  0x80   : > { %v259_v31 = vrot.slane %v258_v29, 1  ;;  %v265_v32 = vadd.f32 %v264_v30, %v263_v28 }
  0x82   : > { %v260_v33 = vadd.f32 %v259_v31, %v258_v29  ;;  %v266_v34 = vrot.slane %v265_v32, 1 }
  0x84   : > { %v267_v36 = vadd.f32 %v266_v34, %v265_v32  ;;  %517 = vlog2.f32 %v260_v33 }
  0x85   : > { %519 = vlog2.f32 %v280_v35 }
  0x86   : > { %521 = vlog2.f32 %v267_v36 }
  0x8e   : > { %v518_v37 = vpop.eup %517 }
  0x8f   : > { %v520_v38 = vpop.eup %519  ;;  %v269_v39 = vmul.f32 0.6931472, %v518_v37 }
  0x90   : > { %v522_v40 = vpop.eup %521  ;;  %v282_v43 = vmul.f32 0.6931472, %v520_v38 }
  0x91   : > { %v271_v41 = vmul.f32 0.6931472, %v522_v40  ;;  %v272_v42 = vadd.f32 %v269_v39, %v236_v13 }
  0x92   : > { %v283_v46 = vsel %vm279_vm1, %v282_v43, 0.0 }
  0x93   : > { %v273_v44 = vadd.f32 %v271_v41, %v243_v15 }
  0x95   : > { %v276_v45 = vcombine.low %v272_v42, %v273_v44 }
  0x97   : > { %v278_v47 = vsub.f32 %v224_v0, %v276_v45 }
  0x99   : > { %v285_v48 = vsub.f32 %v278_v47, %v283_v46 }
  0x9b   : > { %v286_v49 = vmul.f32 %v285_v48, %v225_v26 }
  0x9d   : > { %v294_v50 = vcombine.high %v286_v49, %v286_v49  ;;  %v296_v51 = vsel %vm229_vm0, %v286_v49, 0.0 }
  0x9f   : > { %v297_v52 = vsel %vm229_vm0, %v294_v50, 0.0 }
  0xa0   : > { %v298_v53 = vadd.f32 %v297_v52, %v296_v51 }
  0xa2   : > { %299 = vadd.xlane.f32.xlu0 %v298_v53 }
 0x12f   : > { %v300_v54 = vpop.xlane.xlu0 %299 }
 0x130   : > { %v301_v55 = vrot.slane %v300_v54, 4 }
 0x132   : > { %v302_v56 = vadd.f32 %v301_v55, %v300_v54 }
 0x134   : > { %v303_v57 = vrot.slane %v302_v56, 2 }
 0x136   : > { %v304_v58 = vadd.f32 %v303_v57, %v302_v56 }
 0x138   : > { %v305_v59 = vrot.slane %v304_v58, 1 }
 0x13a   : > { %v306_v60 = vadd.f32 %v305_v59, %v304_v58 }
 0x13c   : > { %445 = vpush %v306_v60 }
 0x16d   : > { %s446_s30 = spop %445 }
 0x16e   : > { %s308_s20 = ssub.f32 0.0, %s446_s30 }
 0x170   : > { %v309_v61 = vstv %s308_s20 }
 0x171   : > { %310 = vst [vmem:[%s216_s21] sm:$0x1] %v309_v61 }
 0x172   : > { %596 = shalt.err (!%p593_p2)
}
 0x173   : > { %s597_s15 = scalar_lea.hbm %s872_s29, 16  ;;  %s601_s6 = scalar_lea.hbm %s923_s2, 32 }
 0x174   : > { %p598_p9 = scmp.ne.s32.totalorder %s872_s29, %s597_s15  ;;  %p602_p6 = scmp.lt.u32.totalorder %s872_s29, %s923_s2 }
 0x175   : > { %p603_p13 = scmp.lt.u32.totalorder %s601_s6, %s597_s15  ;;  %p605_p8 = scmp.lt.u32.totalorder %s597_s15, %s872_s29 }
 0x176   : > { %p599_p11 = pnand %p598_p9, %p936_p0 }
 0x177   : > { %p604_p5 = por %p603_p13, %p602_p6 }
 0x178   : > { %p600_p3 = pneg %p599_p11 }
 0x179   : > { %p606_p7 = por %p605_p8, %p604_p5 }
 0x17b   : > { %p607_p4 = pnand %p606_p7, %p600_p3 }
 0x17d   : > { %610 = shalt.err (!%p607_p4)
}
 0x17e   : > { %451 = dma.vmem_to_hbm [thread:$0]  (%p936_p0), %s874_s7, 16, %s872_s29, %s312_s25  }
 0x17f PF: > { %s336_s21 = sand.u32 1, %s649_s9   ;;  %p937_p10 = scmp.ne.s32.totalorder %s929_s24, 0 }
 0x180   : > { %p938_p12 = scmp.ge.s32.totalorder %s669_s14, 2  ;;  %s337_s19 = scalar_lea.sflag [#allocation5], %s336_s21 }
 0x182   : > { %p461_p1 = pnand %p938_p12, %p937_p10 }
 0x184   : > { %644 = dma.done.wait (!%p461_p1), %s337_s19, 16  }
 0x185   : > { %646 = vsyncadd (!%p461_p1), %s337_s19, 4294967280  ;;  %s21_s14 = sadd.s32 1, %s669_s14   ;;  %s939_s9 = smov %s653_s10 }
 0x186   : > { %p18_p2 = scmp.ge.s32.totalorder %s21_s14, 4   ;;  %s940_s10 = smov %s657_s11 }
 0x187   : > { %s941_s11 = smov %s745_s23  ;;  %s942_s12 = smov %s665_s13 }
 0x188   : > { %s943_s13 = smov %s945_s17  ;;  %20 = sbr.rel (!%p18_p2) target bundleno = 8 (0x8), region = 94 }
 0x18f   :  { %341 = vsyncpa [#allocation4], 1 }
 0x190   :  { %343 = vsyncpa [#allocation4 + $0x1], 1 }
 0x191   :  { %344 = vsyncpa [#allocation7], 1 }
 0x192   :  { %346 = vsyncpa [#allocation7 + $0x1], 1 }
 0x193   :  { %347 = vsyncpa [#allocation5], 1 }
 0x194   :  { %349 = vsyncpa [#allocation5 + $0x1], 1 }

</bundles_post_ra>
